<compile_context>
chip_gen: v5e
topology: v5e:2x2
jax: 0.10.0
libtpu: 0.0.40
codegen_flags: <defaults>
</compile_context>

<pallas_src>
import jax
import jax.numpy as jnp
from jax.experimental import pallas as pl
from jax.experimental.pallas import tpu as pltpu

BN_EPS = 1e-5
DEFAULT_TB = 512  # batch tile: multiple of 128 (v5e MXU width) and of 8 (sublanes);
                  # fits comfortably in the 16 MiB (v5e) scoped-VMEM default.


def _round_up(n, m):
    return ((n + m - 1) // m) * m


def _dsnn_kernel(x_ref, w1_ref, b1_ref, w2_ref, b2_ref, w3_ref, b3_ref, out_ref):
    # x tile -> bf16 for the MXU (f32 accumulation).
    x = x_ref[...].astype(jnp.bfloat16)

    # Linear(IE_dim, 512) with eval-mode BatchNorm folded into w1/b1, then ReLU.
    # (Dropout is identity in eval mode.)
    h = jnp.dot(x, w1_ref[...], preferred_element_type=jnp.float32) + b1_ref[...]
    h = jnp.maximum(h, 0.0)

    # Linear(512, 128) -> Sigmoid.
    h2 = jnp.dot(h.astype(jnp.bfloat16), w2_ref[...],
                 preferred_element_type=jnp.float32) + b2_ref[...]
    h2 = jax.nn.sigmoid(h2)

    # classifier Linear(128, 1): N=1 matmul replaced by VPU mul + lane reduce.
    logits = jnp.sum(h2 * w3_ref[...], axis=-1, keepdims=True) + b3_ref[0]
    preds = jax.nn.sigmoid(logits)

    # Single [TB, 2] store: col 0 = logits, col 1 = predictions.
    out_ref[...] = jnp.concatenate([logits, preds], axis=-1)


def domain_specific_nn_forward(x, fp, *, tb=DEFAULT_TB):
    """x: [B, IE_dim] float32; fp: folded params (see fold_params).

    Returns (logits [B,1], predictions [B,1]) with eval-mode semantics.
    """
    B, D = x.shape
    TB = min(tb, _round_up(B, 8))
    grid = (pl.cdiv(B, TB),)
    H1 = fp["w1"].shape[1]  # 512
    H2 = fp["w2"].shape[1]  # 128

    def resident(shape):
        # Same block index every grid step -> stays resident in VMEM.
        return pl.BlockSpec(shape, lambda i: (0, 0))

    out = pl.pallas_call(
        _dsnn_kernel,
        out_shape=jax.ShapeDtypeStruct((B, 2), jnp.float32),
        grid=grid,
        in_specs=[
            pl.BlockSpec((TB, D), lambda i: (i, 0)),            # x batch tile
            resident((D, H1)),                                  # w1 (bf16, BN folded)
            resident((1, H1)),                                  # b1 (f32, BN folded)
            resident((H1, H2)),                                 # w2 (bf16)
            resident((1, H2)),                                  # b2 (f32)
            resident((1, H2)),                                  # w3 row (f32)
            pl.BlockSpec(memory_space=pltpu.MemorySpace.SMEM),  # b3 scalar
        ],
        out_specs=pl.BlockSpec((TB, 2), lambda i: (i, 0)),
        compiler_params=pltpu.CompilerParams(
            dimension_semantics=("parallel",)),
    )(x, fp["w1"], fp["b1"], fp["w2"], fp["b2"], fp["w3"], fp["b3"])

    return out[:, 0:1], out[:, 1:2]


def init_params(key, ie_dim):
    """Deterministic parameter init mimicking PyTorch shapes (hd=1).

    Weights stored as [in, out] so the kernel does x @ W + b.
    """
    ks = jax.random.split(key, 6)

    def lin(k, fan_in, fan_out):
        bound = 1.0 / jnp.sqrt(fan_in)
        kw, kb = jax.random.split(k)
        w = jax.random.uniform(kw, (fan_in, fan_out), jnp.float32, -bound, bound)
        b = jax.random.uniform(kb, (1, fan_out), jnp.float32, -bound, bound)
        return w, b

    w1, b1 = lin(ks[0], ie_dim, 512)
    w2, b2 = lin(ks[1], 512, 128)
    w3, b3 = lin(ks[2], 128, 1)

    # BatchNorm1d(512) running stats, perturbed so the BN path is exercised.
    bn_gamma = 1.0 + 0.1 * jax.random.normal(ks[3], (1, 512), jnp.float32)
    bn_beta = 0.1 * jax.random.normal(ks[4], (1, 512), jnp.float32)
    bn_mean = 0.05 * jax.random.normal(ks[5], (1, 512), jnp.float32)
    bn_var = jnp.ones((1, 512), jnp.float32)

    return {
        "w1": w1, "b1": b1,
        "bn_gamma": bn_gamma, "bn_beta": bn_beta,
        "bn_mean": bn_mean, "bn_var": bn_var,
        "w2": w2, "b2": b2,
        "w3": w3, "b3": b3,
    }


def fold_params(params, eps=BN_EPS):
    """One-time host-side prep: fold eval-mode BN into layer 1, cast matmul
    weights to bf16, reshape classifier weight to a [1, 128] row + scalar bias."""
    scale = params["bn_gamma"] * jax.lax.rsqrt(params["bn_var"] + eps)       # [1, 512]
    w1 = (params["w1"] * scale).astype(jnp.bfloat16)                          # [D, 512]
    b1 = (params["b1"] - params["bn_mean"]) * scale + params["bn_beta"]       # [1, 512]
    return {
        "w1": w1,
        "b1": b1.astype(jnp.float32),
        "w2": params["w2"].astype(jnp.bfloat16),
        "b2": params["b2"].astype(jnp.float32),
        "w3": params["w3"].reshape(1, -1).astype(jnp.float32),                # [1, 128]
        "b3": params["b3"].reshape(-1).astype(jnp.float32),                   # [1]
    }


def reference_forward(x, p):
    """Pure-JAX f32 reference matching the PyTorch module (eval mode)."""
    h = x @ p["w1"] + p["b1"]
    h = (h - p["bn_mean"]) * jax.lax.rsqrt(p["bn_var"] + BN_EPS) * p["bn_gamma"] + p["bn_beta"]
    h = jnp.maximum(h, 0.0)
    h2 = jax.nn.sigmoid(h @ p["w2"] + p["b2"])
    logits = h2 @ p["w3"] + p["b3"]
    return logits, jax.nn.sigmoid(logits)


def reference_forward_folded(x, fp):
    """Pure-JAX reference on the same numerics path as the kernel
    (folded BN + bf16 matmul operands, f32 accumulation)."""
    h = jnp.dot(x.astype(jnp.bfloat16), fp["w1"],
                preferred_element_type=jnp.float32) + fp["b1"]
    h = jnp.maximum(h, 0.0)
    h2 = jax.nn.sigmoid(jnp.dot(h.astype(jnp.bfloat16), fp["w2"],
                                preferred_element_type=jnp.float32) + fp["b2"])
    logits = jnp.sum(h2 * fp["w3"], axis=-1, keepdims=True) + fp["b3"]
    return logits, jax.nn.sigmoid(logits)


if __name__ == "__main__":
    key = jax.random.PRNGKey(0)
    k_x, k_p, k_x2 = jax.random.split(key, 3)

    B, IE_DIM = 8, 32
    x = jax.random.normal(k_x, (B, IE_DIM), jnp.float32)
    params = init_params(k_p, IE_DIM)
    fparams = fold_params(params)  # one-time prep (BN fold + bf16 weights)

    logits, preds = domain_specific_nn_forward(x, fparams)
    logits = jax.block_until_ready(logits)
    preds = jax.block_until_ready(preds)

    # Tight check against the same numerics path (folded BN + bf16 operands).
    ref_l, ref_p = reference_forward_folded(x, fparams)
    assert jnp.allclose(logits, ref_l, atol=1e-2, rtol=1e-2)
    assert jnp.allclose(preds, ref_p, atol=1e-2, rtol=1e-2)

    # Semantic check against the all-f32 PyTorch-equivalent path (bf16 tolerance).
    f32_l, f32_p = reference_forward(x, params)
    assert jnp.allclose(logits, f32_l, atol=5e-2, rtol=5e-2)
    assert jnp.allclose(preds, f32_p, atol=5e-2, rtol=5e-2)
    assert logits.shape == (B, 1) and preds.shape == (B, 1)

    # Exercise the multi-step batch grid (grid = 4 with TB = 16).
    B2 = 64
    x2 = jax.random.normal(k_x2, (B2, IE_DIM), jnp.float32)
    l2, p2 = domain_specific_nn_forward(x2, fparams, tb=16)
    l2 = jax.block_until_ready(l2)
    p2 = jax.block_until_ready(p2)
    rl2, rp2 = reference_forward_folded(x2, fparams)
    assert jnp.allclose(l2, rl2, atol=1e-2, rtol=1e-2)
    assert jnp.allclose(p2, rp2, atol=1e-2, rtol=1e-2)
    assert l2.shape == (B2, 1) and p2.shape == (B2, 1)

    print("KERNEL_OK")
</pallas_src>

<mosaic_0001>
module attributes {stable_mosaic.version = 11 : i64} {
  func.func @_dsnn_kernel(%arg0: i32, %arg1: memref<8x32xf32, #tpu.memory_space<vmem>>, %arg2: memref<32x512xbf16, #tpu.memory_space<vmem>>, %arg3: memref<1x512xf32, #tpu.memory_space<vmem>>, %arg4: memref<512x128xbf16, #tpu.memory_space<vmem>>, %arg5: memref<1x128xf32, #tpu.memory_space<vmem>>, %arg6: memref<1x128xf32, #tpu.memory_space<vmem>>, %arg7: memref<1xf32, #tpu.memory_space<smem>>, %arg8: memref<8x2xf32, #tpu.memory_space<vmem>>) attributes {dimension_semantics = [#tpu.dimension_semantics<parallel>], iteration_bounds = array<i64: 1>, scalar_prefetch = 0 : i64, scratch_operands = 0 : i64, tpu.core_type = #tpu.core_type<tc>, window_params = [{transform_indices = @transform_0, window_bounds = array<i64: 8, 32>}, {pipeline_mode = #tpu.pipeline_mode<synchronous>, transform_indices = @transform_1, window_bounds = array<i64: 32, 512>}, {pipeline_mode = #tpu.pipeline_mode<synchronous>, transform_indices = @transform_2, window_bounds = array<i64: 1, 512>}, {pipeline_mode = #tpu.pipeline_mode<synchronous>, transform_indices = @transform_3, window_bounds = array<i64: 512, 128>}, {pipeline_mode = #tpu.pipeline_mode<synchronous>, transform_indices = @transform_4, window_bounds = array<i64: 1, 128>}, {pipeline_mode = #tpu.pipeline_mode<synchronous>, transform_indices = @transform_5, window_bounds = array<i64: 1, 128>}, {transform_indices = @transform_6, window_bounds = array<i64: 1>}, {transform_indices = @transform_7, window_bounds = array<i64: 8, 2>}]} {
    %c0 = arith.constant 0 : index
    %c0_0 = arith.constant 0 : index
    %0 = vector.load %arg1[%c0, %c0_0] : memref<8x32xf32, #tpu.memory_space<vmem>>, vector<8x32xf32>
    %1 = arith.truncf %0 : vector<8x32xf32> to vector<8x32xbf16>
    %c0_1 = arith.constant 0 : index
    %c0_2 = arith.constant 0 : index
    %2 = vector.load %arg2[%c0_1, %c0_2] : memref<32x512xbf16, #tpu.memory_space<vmem>>, vector<32x512xbf16>
    %cst = arith.constant dense<0.000000e+00> : vector<8x512xf32>
    %3 = tpu.matmul %1, %2, %cst {dimension_numbers = #tpu.dot_dimension_numbers<[1], [0], [0], [1], [0, 0, 1, 1], [], []>} : vector<8x32xbf16>, vector<32x512xbf16>, vector<8x512xf32> -> vector<8x512xf32>
    %c0_3 = arith.constant 0 : index
    %c0_4 = arith.constant 0 : index
    %4 = vector.load %arg3[%c0_3, %c0_4] : memref<1x512xf32, #tpu.memory_space<vmem>>, vector<1x512xf32>
    %5 = vector.broadcast %4 : vector<1x512xf32> to vector<8x512xf32>
    %6 = arith.addf %3, %5 : vector<8x512xf32>
    %cst_5 = arith.constant 0.000000e+00 : f32
    %7 = vector.broadcast %cst_5 : f32 to vector<8x512xf32>
    %8 = arith.maximumf %6, %7 : vector<8x512xf32>
    %9 = arith.truncf %8 : vector<8x512xf32> to vector<8x512xbf16>
    %c0_6 = arith.constant 0 : index
    %c0_7 = arith.constant 0 : index
    %10 = vector.load %arg4[%c0_6, %c0_7] : memref<512x128xbf16, #tpu.memory_space<vmem>>, vector<512x128xbf16>
    %cst_8 = arith.constant dense<0.000000e+00> : vector<8x128xf32>
    %11 = tpu.matmul %9, %10, %cst_8 {dimension_numbers = #tpu.dot_dimension_numbers<[1], [0], [0], [1], [0, 0, 1, 1], [], []>} : vector<8x512xbf16>, vector<512x128xbf16>, vector<8x128xf32> -> vector<8x128xf32>
    %c0_9 = arith.constant 0 : index
    %c0_10 = arith.constant 0 : index
    %12 = vector.load %arg5[%c0_9, %c0_10] : memref<1x128xf32, #tpu.memory_space<vmem>>, vector<1x128xf32>
    %13 = vector.broadcast %12 : vector<1x128xf32> to vector<8x128xf32>
    %14 = arith.addf %11, %13 : vector<8x128xf32>
    %15 = arith.negf %14 : vector<8x128xf32>
    %16 = math.exp %15 : vector<8x128xf32>
    %cst_11 = arith.constant 1.000000e+00 : f32
    %17 = vector.broadcast %cst_11 : f32 to vector<8x128xf32>
    %18 = arith.addf %17, %16 : vector<8x128xf32>
    %19 = arith.divf %17, %18 : vector<8x128xf32>
    %c0_12 = arith.constant 0 : index
    %c0_13 = arith.constant 0 : index
    %20 = vector.load %arg6[%c0_12, %c0_13] : memref<1x128xf32, #tpu.memory_space<vmem>>, vector<1x128xf32>
    %21 = vector.broadcast %20 : vector<1x128xf32> to vector<8x128xf32>
    %22 = arith.mulf %19, %21 : vector<8x128xf32>
    %cst_14 = arith.constant dense<0.000000e+00> : vector<8xf32>
    %23 = vector.multi_reduction <add>, %22, %cst_14 [1] : vector<8x128xf32> to vector<8xf32>
    %24 = vector.shape_cast %23 : vector<8xf32> to vector<8x1xf32>
    %c0_15 = arith.constant 0 : index
    %25 = memref.load %arg7[%c0_15] : memref<1xf32, #tpu.memory_space<smem>>
    %26 = vector.broadcast %25 : f32 to vector<8x1xf32>
    %27 = arith.addf %24, %26 : vector<8x1xf32>
    %28 = arith.negf %27 : vector<8x1xf32>
    %29 = math.exp %28 : vector<8x1xf32>
    %cst_16 = arith.constant 1.000000e+00 : f32
    %30 = vector.broadcast %cst_16 : f32 to vector<8x1xf32>
    %31 = arith.addf %30, %29 : vector<8x1xf32>
    %32 = arith.divf %30, %31 : vector<8x1xf32>
    %33 = tpu.concatenate %27, %32 in 1 : vector<8x1xf32>, vector<8x1xf32> -> vector<8x2xf32>
    %c0_17 = arith.constant 0 : index
    %c0_18 = arith.constant 0 : index
    %34 = vector.load %arg8[%c0_17, %c0_18] : memref<8x2xf32, #tpu.memory_space<vmem>>, vector<8x2xf32>
    tpu.vector_store %arg8[%c0_17, %c0_18], %33 {strides = array<i32>} : memref<8x2xf32, #tpu.memory_space<vmem>>, vector<8x2xf32>,
    return
  }
  func.func @transform_0(%arg0: i32) -> (i32, i32) {
    %c0_i32 = arith.constant 0 : i32
    %c0_i32_0 = arith.constant 0 : i32
    return %arg0, %c0_i32 : i32, i32
  }
  func.func @transform_1(%arg0: i32) -> (i32, i32) {
    %c0_i32 = arith.constant 0 : i32
    %c0_i32_0 = arith.constant 0 : i32
    %c0_i32_1 = arith.constant 0 : i32
    return %c0_i32, %c0_i32_0 : i32, i32
  }
  func.func @transform_2(%arg0: i32) -> (i32, i32) {
    %c0_i32 = arith.constant 0 : i32
    %c0_i32_0 = arith.constant 0 : i32
    %c0_i32_1 = arith.constant 0 : i32
    return %c0_i32, %c0_i32_0 : i32, i32
  }
  func.func @transform_3(%arg0: i32) -> (i32, i32) {
    %c0_i32 = arith.constant 0 : i32
    %c0_i32_0 = arith.constant 0 : i32
    %c0_i32_1 = arith.constant 0 : i32
    return %c0_i32, %c0_i32_0 : i32, i32
  }
  func.func @transform_4(%arg0: i32) -> (i32, i32) {
    %c0_i32 = arith.constant 0 : i32
    %c0_i32_0 = arith.constant 0 : i32
    %c0_i32_1 = arith.constant 0 : i32
    return %c0_i32, %c0_i32_0 : i32, i32
  }
  func.func @transform_5(%arg0: i32) -> (i32, i32) {
    %c0_i32 = arith.constant 0 : i32
    %c0_i32_0 = arith.constant 0 : i32
    %c0_i32_1 = arith.constant 0 : i32
    return %c0_i32, %c0_i32_0 : i32, i32
  }
  func.func @transform_6(%arg0: i32) -> i32 {
    %c0_i32 = arith.constant 0 : i32
    %c0_i32_0 = arith.constant 0 : i32
    return %c0_i32 : i32
  }
  func.func @transform_7(%arg0: i32) -> (i32, i32) {
    %c0_i32 = arith.constant 0 : i32
    %c0_i32_0 = arith.constant 0 : i32
    return %arg0, %c0_i32 : i32, i32
  }
}

</mosaic_0001>

<bundles_post_ra>
// kernel: tpu_custom_call.1
= control target key start
LH: loop header
LB: loop body
LE: loop exit
PB: predicated region body
PF: predicated region fallthrough
CT: control target
= control target key end

     0   :  { %13 = vsyncpa [#allocation4], 0  ;;  %s980_s0 = inlined_call_operand.hbm [shape: f32[8,32], index: 0, kind: input, shape index: {}]   ;;  %s981_s1 = inlined_call_operand.hbm [shape: bf16[32,512], index: 1, kind: input, shape index: {}]   ;;  %s982_s2 = inlined_call_operand.hbm [shape: f32[1,512], index: 2, kind: input, shape index: {}]   ;;  %s983_s3 = inlined_call_operand.hbm [shape: bf16[512,128], index: 3, kind: input, shape index: {}]   ;;  %s984_s4 = inlined_call_operand.vmem [shape: f32[1,128], index: 4, kind: input, shape index: {}]   ;;  %s985_s5 = inlined_call_operand.vmem [shape: f32[1,128], index: 5, kind: input, shape index: {}]   ;;  %s986_s6 = inlined_call_operand.<no memory space> [shape: f32[1], index: 6, kind: input, shape index: {}]   ;;  %s987_s7 = inlined_call_operand.vmem [shape: f32[8,2], index: 7, kind: output, shape index: {}]  }
   0x1   :  { %14 = vsyncpa [#allocation6], 0  ;;  %s31_s26 = sshll.u32 %s981_s1, 4  ;;  %s32_s26 = int_to_ptr.hbm [resolvable:$true] %s31_s26 }
   0x2   :  { %15 = vsyncpa [#allocation9], 0  ;;  %s908_s27 = smov [#allocation5]   ;;  %s21_s8 = sshll.u32 %s980_s0, 4  ;;  %s22_s8 = int_to_ptr.hbm [resolvable:$true] %s21_s8 }
   0x3   :  { %s33_s28 = sshll.u32 %s908_s27, 4  ;;  %s909_s9 = smov 256   ;;  %s34_s28 = int_to_ptr.vmem [resolvable:$true] %s33_s28 }
   0x4   :  { %s910_s10 = smov 16   ;;  %s911_s11 = smov [#allocation3]  }
   0x5   :  { %39 = dma.hbm_to_vmem [thread:$0]  %s32_s26, 1024, %s34_s28, [#allocation6], %s909_s9, %s909_s9, %s910_s10  }
   0x6   :  { %s23_s12 = sshll.u32 %s911_s11, 4  ;;  %s45_s15 = sshll.u32 %s982_s2, 4  ;;  %s24_s12 = int_to_ptr.vmem [resolvable:$true] %s23_s12  ;;  %s46_s15 = int_to_ptr.hbm [resolvable:$true] %s45_s15 }
   0x7   :  { %26 = dma.hbm_to_vmem [thread:$0]  %s22_s8, 128, %s24_s12, [#allocation4]  }
   0x8   :  { %s55_s17 = sshll.u32 %s983_s3, 4  ;;  %s912_s18 = smov [#allocation7]   ;;  %s56_s17 = int_to_ptr.hbm [resolvable:$true] %s55_s17 }
   0x9   :  { %s47_s19 = sshll.u32 %s912_s18, 4  ;;  %s913_s0 = smov [#allocation8]   ;;  %s48_s19 = int_to_ptr.vmem [resolvable:$true] %s47_s19 }
   0xa   :  { %50 = dma.hbm_to_vmem [thread:$0]  %s46_s15, 64, %s48_s19, [#allocation6]  }
   0xb   :  { %s57_s20 = sshll.u32 %s913_s0, 4  ;;  %s914_s21 = smov 64   ;;  %s58_s20 = int_to_ptr.vmem [resolvable:$true] %s57_s20 }
   0xc   :  { %s915_s22 = smov 4  }
   0xd   :  { %63 = dma.hbm_to_vmem [thread:$0]  %s56_s17, 4096, %s58_s20, [#allocation9], %s914_s21, %s914_s21, %s915_s22  }
   0xe   :  { %902 = dma.done.wait [#allocation4], 128  }
   0xf   :  { %903 = vsyncadd [#allocation4], 4294967168 }
  0x10   :  { %904 = dma.done.wait [#allocation6], 1088  }
  0x11   :  { %905 = vsyncadd [#allocation6], 4294966208 }
  0x12   :  { %906 = dma.done.wait [#allocation9], 4096  }
  0x13   :  { %907 = vsyncadd [#allocation9], 4294963200  ;;  %v600_v0 = vld [vmem:[#allocation5 + $0x20] sm:$0xf]  ;;  %v754_v1 = vld [vmem:[#allocation5 + $0x2c] sm:$0xf0] }
  0x14   :  { %v608_v2 = vld [vmem:[#allocation5 + $0x28] sm:$0xf]  ;;  %v601_v3 = vor.u32 %v754_v1, %v600_v0  ;;  %v755_v4 = vld [vmem:[#allocation5 + $0x34] sm:$0xf0]  ;;  %v753_v5 = vld [vmem:[#allocation5 + $0x2c] sm:$0xf] }
  0x15   :  { %v610_v6 = vld [vmem:[#allocation5 + $0x38] sm:$0xf0]  ;;  %v609_v7 = vor.u32 %v755_v4, %v608_v2  ;;  %v752_v9 = vld [vmem:[#allocation5 + $0x24] sm:$0xf]  ;;  %v602_v10 = vld [vmem:[#allocation5 + $0x30] sm:$0xf0] }
  0x16   :  { %v613_v8 = vor.u32 %v753_v5, %v610_v6  ;;  %v584_v11 = vld [vmem:[#allocation5] sm:$0xf]  ;;  %157 = vmatpush.bf16.msra.mxu0 %v601_v3  ;;  %v605_v12 = vor.u32 %v752_v9, %v602_v10  ;;  %v750_v13 = vld [vmem:[#allocation5 + $0xc] sm:$0xf0]  ;;  %v592_v14 = vld [vmem:[#allocation5 + $0x8] sm:$0xf] }
  0x17   :  { %v751_v15 = vld [vmem:[#allocation5 + $0x14] sm:$0xf0]  ;;  %183 = vmatpush.bf16.msra.mxu2 %v609_v7  ;;  %v585_v16 = vor.u32 %v750_v13, %v584_v11  ;;  %v749_v18 = vld [vmem:[#allocation5 + $0xc] sm:$0xf]  ;;  %v594_v19 = vld [vmem:[#allocation5 + $0x18] sm:$0xf0] }
  0x18   :  { %196 = vmatpush.bf16.msra.mxu3 %v613_v8  ;;  %v593_v17 = vor.u32 %v751_v15, %v592_v14  ;;  %v748_v20 = vld [vmem:[#allocation5 + $0x4] sm:$0xf]  ;;  %170 = vmatpush.bf16.msra.mxu1 %v605_v12  ;;  %v597_v21 = vor.u32 %v749_v18, %v594_v19  ;;  %v586_v22 = vld [vmem:[#allocation5 + $0x10] sm:$0xf0]  ;;  %v87_v23 = vld [vmem:[#allocation3] sm:$0xff]  ;;  %vm147_vm0 = vcmask 261120  }
  0x19   :  { %v763_v24 = vld [vmem:[#allocation8 + $0x38] sm:$0xff]  ;;  %v589_v25 = vor.u32 %v748_v20, %v586_v22  ;;  %v88_v26 = vpack.c.bf16 %v87_v23, %v87_v23  ;;  %v762_v29 = vld [vmem:[#allocation8 + $0x30] sm:$0xff]  ;;  %v761_v32 = vld [vmem:[#allocation8 + $0x28] sm:$0xff]  ;;  %vm571_vm8 = vcmask 7168   ;;  %vm573_vm10 = vcmask 15360  }
  0x1a   :  { %v771_v27 = vld [vmem:[#allocation8 + $0x78] sm:$0xff]  ;;  %158 = vmatpush.bf16.msra.mxu0 %v585_v16  ;;  %v770_v31 = vld [vmem:[#allocation8 + $0x70] sm:$0xff]  ;;  %v769_v35 = vld [vmem:[#allocation8 + $0x68] sm:$0xff] }
  0x1b   :  { %184 = vmatpush.bf16.msra.mxu2 %v593_v17  ;;  %v779_v28 = vld [vmem:[#allocation8 + $0xb8] sm:$0xff]  ;;  %v778_v33 = vld [vmem:[#allocation8 + $0xb0] sm:$0xff]  ;;  %v777_v36 = vld [vmem:[#allocation8 + $0xa8] sm:$0xff] }
  0x1c   :  { %197 = vmatpush.bf16.msra.mxu3 %v597_v21  ;;  %171 = vmatpush.bf16.msra.mxu1 %v589_v25  ;;  %v787_v30 = vld [vmem:[#allocation8 + $0xf8] sm:$0xff]  ;;  %v786_v34 = vld [vmem:[#allocation8 + $0xf0] sm:$0xff]  ;;  %v760_v37 = vld [vmem:[#allocation8 + $0x20] sm:$0xff] }
  0x1d   :  { %614 = vmatmul.msk.bf16.vlgmr.msra.gmra.mxu0 %vm147_vm0, %v88_v26  ;;  %v785_v38 = vld [vmem:[#allocation8 + $0xe8] sm:$0xff]  ;;  %v768_v39 = vld [vmem:[#allocation8 + $0x60] sm:$0xff]  ;;  %v759_v41 = vld [vmem:[#allocation8 + $0x18] sm:$0xff] }
  0x1e   :  { %471 = vmatpush.bf16.msrb.mxu0 %v763_v24  ;;  %616 = vmatmul.msk.bf16.vlgmr.msra.gmra.mxu2 %vm147_vm0, %v88_v26  ;;  %v776_v40 = vld [vmem:[#allocation8 + $0xa0] sm:$0xff]  ;;  %v767_v43 = vld [vmem:[#allocation8 + $0x58] sm:$0xff]  ;;  %v758_v45 = vld [vmem:[#allocation8 + $0x10] sm:$0xff] }
  0x1f   :  { %617 = vmatmul.msk.bf16.vlgmr.msra.gmra.mxu3 %vm147_vm0, %v88_v26  ;;  %615 = vmatmul.msk.bf16.vlgmr.msra.gmra.mxu1 %vm147_vm0, %v88_v26  ;;  %v784_v42 = vld [vmem:[#allocation8 + $0xe0] sm:$0xff]  ;;  %v775_v44 = vld [vmem:[#allocation8 + $0x98] sm:$0xff]  ;;  %v766_v47 = vld [vmem:[#allocation8 + $0x50] sm:$0xff] }
  0x20   :  { %484 = vmatpush.bf16.msrb.mxu1 %v771_v27  ;;  %497 = vmatpush.bf16.msrb.mxu2 %v779_v28  ;;  %v783_v46 = vld [vmem:[#allocation8 + $0xd8] sm:$0xff]  ;;  %v757_v48 = vld [vmem:[#allocation8 + $0x8] sm:$0xff]  ;;  %v774_v50 = vld [vmem:[#allocation8 + $0x90] sm:$0xff] }
  0x21   :  { %510 = vmatpush.bf16.msrb.mxu3 %v787_v30  ;;  %v765_v49 = vld [vmem:[#allocation8 + $0x48] sm:$0xff]  ;;  %v782_v51 = vld [vmem:[#allocation8 + $0xd0] sm:$0xff]  ;;  %v756_v52 = vld [vmem:[#allocation8] sm:$0xff] }
  0x22   :  { %472 = vmatpush.bf16.msrb.mxu0 %v762_v29  ;;  %v764_v53 = vld [vmem:[#allocation8 + $0x40] sm:$0xff]  ;;  %v773_v54 = vld [vmem:[#allocation8 + $0x88] sm:$0xff]  ;;  %v97_v58 = vld [vmem:[#allocation7] sm:$0xf] }
  0x23   :  { %v781_v55 = vld [vmem:[#allocation8 + $0xc8] sm:$0xff]  ;;  %v772_v56 = vld [vmem:[#allocation8 + $0x80] sm:$0xff]  ;;  %v99_v59 = vperm.slane %v97_v58, 0  ;;  %v100_v60 = vperm.slane %v97_v58, 1  ;;  %v101_v2 = vperm.slane %v97_v58, 2  ;;  %v102_v3 = vperm.slane %v97_v58, 3 }
  0x24   :  { %485 = vmatpush.bf16.msrb.mxu1 %v770_v31  ;;  %498 = vmatpush.bf16.msrb.mxu2 %v778_v33  ;;  %v780_v57 = vld [vmem:[#allocation8 + $0xc0] sm:$0xff]  ;;  %v796_v20 = vld [vmem:[%s984_s4] ss:$0 sm:$0xff] }
  0x25   :  { %511 = vmatpush.bf16.msrb.mxu3 %v786_v34 }
  0x26   :  { %473 = vmatpush.bf16.msrb.mxu0 %v761_v32 }
  0x28   :  { %486 = vmatpush.bf16.msrb.mxu1 %v769_v35  ;;  %499 = vmatpush.bf16.msrb.mxu2 %v777_v36 }
  0x29   :  { %512 = vmatpush.bf16.msrb.mxu3 %v785_v38 }
  0x2a   :  { %474 = vmatpush.bf16.msrb.mxu0 %v760_v37 }
  0x2c   :  { %487 = vmatpush.bf16.msrb.mxu1 %v768_v39  ;;  %500 = vmatpush.bf16.msrb.mxu2 %v776_v40 }
  0x2d   :  { %513 = vmatpush.bf16.msrb.mxu3 %v784_v42  ;;  %v797_v42 = vld [vmem:[%s985_s5] ss:$0 sm:$0xff] }
  0x2e   :  { %475 = vmatpush.bf16.msrb.mxu0 %v759_v41 }
  0x30   :  { %488 = vmatpush.bf16.msrb.mxu1 %v767_v43  ;;  %501 = vmatpush.bf16.msrb.mxu2 %v775_v44 }
  0x31   :  { %514 = vmatpush.bf16.msrb.mxu3 %v783_v46 }
  0x32   :  { %476 = vmatpush.bf16.msrb.mxu0 %v758_v45 }
  0x34   :  { %489 = vmatpush.bf16.msrb.mxu1 %v766_v47  ;;  %502 = vmatpush.bf16.msrb.mxu2 %v774_v50  ;;  %v550_v47 = vstv %s986_s6 }
  0x35   :  { %515 = vmatpush.bf16.msrb.mxu3 %v782_v51 }
  0x36   :  { %477 = vmatpush.bf16.msrb.mxu0 %v757_v48 }
  0x38   :  { %490 = vmatpush.bf16.msrb.mxu1 %v765_v49  ;;  %503 = vmatpush.bf16.msrb.mxu2 %v773_v54 }
  0x39   :  { %516 = vmatpush.bf16.msrb.mxu3 %v781_v55 }
  0x3a   :  { %478 = vmatpush.bf16.msrb.mxu0 %v756_v52 }
  0x3c   :  { %491 = vmatpush.bf16.msrb.mxu1 %v764_v53  ;;  %504 = vmatpush.bf16.msrb.mxu2 %v772_v56 }
  0x3d   :  { %517 = vmatpush.bf16.msrb.mxu3 %v780_v57 }
  0x9a   :  { %v160_v61 = vpop.f32.mrf.mxu0 }
  0x9b   :  { %v161_v62 = vadd.f32 %v160_v61, %v99_v59 }
  0x9c   :  { %v173_v63 = vpop.f32.mrf.mxu1 }
  0x9d   :  { %v203_v0 = vmax.f32 %v161_v62, 0.0  ;;  %v174_v1 = vadd.f32 %v173_v63, %v100_v60 }
  0x9f   :  { %v207_v4 = vpack.c.bf16 %v203_v0, %v203_v0  ;;  %v204_v5 = vmax.f32 %v174_v1, 0.0 }
  0xa1   :  { %v208_v6 = vpack.c.bf16 %v204_v5, %v204_v5  ;;  %v186_v7 = vpop.f32.mrf.mxu2  ;;  %479 = vmatmul.bf16.vlgmr.msrb.gmra.mxu0 %v207_v4 }
  0xa2   :  { %v199_v8 = vpop.f32.mrf.mxu3  ;;  %v187_v9 = vadd.f32 %v186_v7, %v101_v2  ;;  %v162_v11 = vpop.f32.mrf.mxu0 }
  0xa3   :  { %v200_v10 = vadd.f32 %v199_v8, %v102_v3  ;;  %492 = vmatmul.bf16.vlgmr.msrb.gmra.mxu1 %v208_v6 }
  0xa4   :  { %v205_v12 = vmax.f32 %v187_v9, 0.0  ;;  %v175_v14 = vpop.f32.mrf.mxu1 }
  0xa5   :  { %v206_v13 = vmax.f32 %v200_v10, 0.0 }
  0xa6   :  { %v209_v15 = vpack.c.bf16 %v205_v12, %v205_v12 }
  0xa7   :  { %v210_v16 = vpack.c.bf16 %v206_v13, %v206_v13 }
  0xa8   :  { %505 = vmatmul.bf16.vlgmr.msrb.gmra.mxu2 %v209_v15 }
  0xa9   :  { %518 = vmatmul.bf16.vlgmr.msrb.gmra.mxu3 %v210_v16  ;;  %v188_v17 = vpop.f32.mrf.mxu2 }
  0xaa   :  { %v201_v18 = vpop.f32.mrf.mxu3 }
 0x11e   :  { %v480_v19 = vpop.f32.mrf.mxu0 }
 0x11f   :  { %v481_v22 = vadd.f32 %v796_v20, %v480_v19 }
 0x120   :  { %v493_v21 = vpop.f32.mrf.mxu1 }
 0x121   :  { %v494_v24 = vadd.f32 %v493_v21, %v481_v22 }
 0x126   :  { %v482_v23 = vpop.f32.mrf.mxu0 }
 0x128   :  { %v495_v25 = vpop.f32.mrf.mxu1 }
 0x12b   :  { %v506_v26 = vpop.f32.mrf.mxu2 }
 0x12c   :  { %v519_v27 = vpop.f32.mrf.mxu3  ;;  %v507_v28 = vadd.f32 %v506_v26, %v494_v24 }
 0x12e   :  { %v520_v29 = vadd.f32 %v519_v27, %v507_v28 }
 0x130   :  { %v746_v30 = vmul.f32 -1.442695, %v520_v29 }
 0x132   :  { %798 = vpow2.f32 %v746_v30 }
 0x133   :  { %v508_v31 = vpop.f32.mrf.mxu2 }
 0x134   :  { %v521_v32 = vpop.f32.mrf.mxu3 }
 0x138   :  { %v799_v33 = vpop.eup %798 }
 0x139   :  { %v526_v34 = vadd.f32 1.0, %v799_v33 }
 0x13b   :  { %800 = vrcp.f32 %v526_v34  ;;  %v538_v38 = vand.u32 2147483648, %v526_v34  ;;  %v536_v40 = vand.u32 2147483647, %v526_v34  ;;  %vm532_vm2 = vweird.f32 %v526_v34 }
 0x13d   :  { %v539_v43 = vor.u32 1.1754944e-38, %v538_v38  ;;  %vm537_vm4 = vcmp.eq.f32.partialorder %v536_v40, 8.507059e+37 }
 0x141   :  { %v801_v35 = vpop.eup %800 }
 0x142   :  { %v528_v36 = vmul.f32 %v801_v35, %v526_v34  ;;  %vm533_vm1 = vweird.f32 %v801_v35 }
 0x143   :  { %vm534_vm3 = vmor %vm532_vm2, %vm533_vm1 }
 0x144   :  { %v529_v37 = vsub.f32 1.0, %v528_v36 }
 0x146   :  { %v530_v39 = vmul.f32 %v801_v35, %v529_v37 }
 0x148   :  { %v531_v41 = vadd.f32 %v801_v35, %v530_v39 }
 0x14a   :  { %v535_v44 = vsel %vm534_vm3, %v801_v35, %v531_v41 }
 0x14b   :  { %v540_v45 = vsel %vm537_vm4, %v539_v43, %v535_v44 }
 0x14c   :  { %v546_v46 = vmul.f32 %v797_v42, %v540_v45 }
 0x14e   :  { %547 = vadd.xlane.f32.xlu0 %v546_v46 }
 0x1c1   :  { %v548_v48 = vpop.xlane.xlu0 %547 }
 0x1c2   :  { %v551_v49 = vadd.f32 %v550_v47, %v548_v48 }
 0x1c4   :  { %v747_v50 = vmul.f32 -1.442695, %v551_v49 }
 0x1c6   :  { %802 = vpow2.f32 %v747_v50 }
 0x1cc   :  { %v803_v51 = vpop.eup %802 }
 0x1cd   :  { %v555_v52 = vadd.f32 1.0, %v803_v51 }
 0x1cf   :  { %804 = vrcp.f32 %v555_v52  ;;  %v567_v56 = vand.u32 2147483648, %v555_v52  ;;  %v565_v58 = vand.u32 2147483647, %v555_v52  ;;  %vm561_vm6 = vweird.f32 %v555_v52 }
 0x1d1   :  { %v568_v60 = vor.u32 1.1754944e-38, %v567_v56  ;;  %vm566_vm9 = vcmp.eq.f32.partialorder %v565_v58, 8.507059e+37 }
 0x1d5   :  { %v805_v53 = vpop.eup %804 }
 0x1d6   :  { %v557_v54 = vmul.f32 %v805_v53, %v555_v52  ;;  %vm562_vm5 = vweird.f32 %v805_v53 }
 0x1d7   :  { %vm563_vm7 = vmor %vm561_vm6, %vm562_vm5 }
 0x1d8   :  { %v558_v55 = vsub.f32 1.0, %v557_v54 }
 0x1da   :  { %v559_v57 = vmul.f32 %v805_v53, %v558_v55 }
 0x1dc   :  { %v560_v59 = vadd.f32 %v805_v53, %v559_v57 }
 0x1de   :  { %v564_v61 = vsel %vm563_vm7, %v805_v53, %v560_v59 }
 0x1df   :  { %v569_v62 = vsel %vm566_vm9, %v568_v60, %v564_v61 }
 0x1e0   :  { %v572_v63 = vsel %vm571_vm8, %v551_v49, %v569_v62 }
 0x1e1   :  { %574 = vst.msk [vmem:[%s987_s7] sm:$0xff] %vm573_vm10, %v572_v63 }
 0x1e2   :  { %579 = vsyncpa [#allocation4], 1 }
 0x1e3   :  { %580 = vsyncpa [#allocation6], 1 }
 0x1e4   :  { %581 = vsyncpa [#allocation9], 1 }

</bundles_post_ra>
